<compile_context>
chip_gen: v7x
topology: tpu7x:2x2x1
jax: 0.10.0
libtpu: 0.0.40
codegen_flags: <defaults>
</compile_context>

<pallas_src>
import jax
import jax.numpy as jnp
from jax.experimental import pallas as pl
from jax.experimental.pallas import tpu as pltpu


# -----------------------------------------------------------------------------
# Kernel: per-row-tile, per-lane partial sum of squared errors over all stages.
# -----------------------------------------------------------------------------
def _make_sse_kernel(num_stages: int):
    def kernel(*refs):
        # refs = (pred_0, ..., pred_{S-1}, target, out)
        out_ref = refs[-1]
        targ = refs[num_stages][...].astype(jnp.float32)          # (TR8, 8, 128)
        acc = jnp.zeros((1, 8, 128), jnp.float32)
        for s in range(num_stages):
            d = refs[s][...].astype(jnp.float32) - targ
            # Reduce over the leading (vreg-row) axis only: pure VPU adds,
            # no cross-lane / cross-sublane XLU work, full-vreg result.
            acc = acc + jnp.sum(d * d, axis=0, keepdims=True)
        out_ref[...] = acc

    return kernel


# -----------------------------------------------------------------------------
# Layout helpers.
# -----------------------------------------------------------------------------
def _flatten_to_vregs(x: jax.Array) -> jax.Array:
    """Flatten row-major, zero-pad to a multiple of 1024 elems, view as
    (r8, 8, 128) vreg-rows.  Keeps the original dtype (cast happens in-kernel)."""
    flat = x.reshape(-1)
    n = flat.shape[0]
    padded = ((n + 1023) // 1024) * 1024
    if padded != n:
        flat = jnp.pad(flat, (0, padded - n))
    return flat.reshape(-1, 8, 128)


def _choose_tile(r8: int, num_stages: int) -> int:
    """Row-tile (in units of 8-sublane vreg rows).  Cap so that the
    double-buffered input working set stays ~<= 24 MiB (safe on v7x 64 MiB)."""
    bytes_per_r8_row = 8 * 128 * 4                      # f32 worst case
    budget = 24 * 1024 * 1024
    max_by_vmem = max(1, budget // (2 * (num_stages + 1) * bytes_per_r8_row))
    return max(1, min(256, r8, max_by_vmem))            # <= 2048 rows per tile


# -----------------------------------------------------------------------------
# One MSE group (all stages share one target): returns total SSE (scalar f32).
# -----------------------------------------------------------------------------
def _group_sse(preds, target) -> jax.Array:
    num_stages = len(preds)
    targ3 = _flatten_to_vregs(target)
    pred3 = [_flatten_to_vregs(p) for p in preds]

    r8 = targ3.shape[0]
    tr8 = _choose_tile(r8, num_stages)
    num_tiles = pl.cdiv(r8, tr8)
    pad_r8 = num_tiles * tr8
    if pad_r8 != r8:
        pad = ((0, pad_r8 - r8), (0, 0), (0, 0))
        targ3 = jnp.pad(targ3, pad)
        pred3 = [jnp.pad(p, pad) for p in pred3]

    block = (tr8, 8, 128)
    idx = lambda r: (r, 0, 0)
    in_specs = [pl.BlockSpec(block, idx) for _ in range(num_stages + 1)]
    out_spec = pl.BlockSpec((1, 8, 128), idx)

    n_elem = pad_r8 * 8 * 128
    in_bytes = sum(int(p.size) * p.dtype.itemsize for p in pred3) + \
        int(targ3.size) * targ3.dtype.itemsize
    out_bytes = num_tiles * 8 * 128 * 4
    cost = pl.CostEstimate(
        flops=3 * num_stages * n_elem,        # sub + mul + add per element/stage
        transcendentals=0,
        bytes_accessed=in_bytes + out_bytes,
    )

    partials = pl.pallas_call(
        _make_sse_kernel(num_stages),
        out_shape=jax.ShapeDtypeStruct((num_tiles, 8, 128), jnp.float32),
        grid_spec=pltpu.PrefetchScalarGridSpec(
            num_scalar_prefetch=0,
            grid=(num_tiles,),
            in_specs=in_specs,
            out_specs=out_spec,
        ),
        compiler_params=pltpu.CompilerParams(
            # Each grid step writes a distinct output block -> safe to shard
            # row tiles across TensorCores (megacore on v7x, no-op on 1-TC chips).
            dimension_semantics=("parallel",),
        ),
        cost_estimate=cost,
    )(*pred3, targ3)

    # Tiny finalize reduction in plain JAX (num_tiles * 1024 elements).
    return jnp.sum(partials)


# -----------------------------------------------------------------------------
# PoseLoss.forward equivalent.
# -----------------------------------------------------------------------------
@jax.jit
def pose_loss(save_for_loss_pafs, save_for_loss_htmps, paf_target, htmp_target):
    """sum_s MSE(paf_s, paf_target) + sum_s MSE(htmp_s, htmp_target)."""
    paf_sse = _group_sse(list(save_for_loss_pafs), paf_target)
    htmp_sse = _group_sse(list(save_for_loss_htmps), htmp_target)
    # Per-stage MSE = SSE_s / numel; summed over stages = total SSE / numel.
    return paf_sse / jnp.float32(paf_target.size) + \
        htmp_sse / jnp.float32(htmp_target.size)


# -----------------------------------------------------------------------------
# Test harness.
# -----------------------------------------------------------------------------
if __name__ == "__main__":
    key = jax.random.PRNGKey(0)

    # Small shapes consistent with a multi-stage pose network (NCHW):
    #   PAF maps:     (N=2, C=4, H=16, W=16), 3 stages
    #   Heatmap maps: (N=2, C=2, H=16, W=16), 3 stages
    n_paf_stages, n_htmp_stages = 3, 3
    paf_shape = (2, 4, 16, 16)
    htmp_shape = (2, 2, 16, 16)

    keys = jax.random.split(key, n_paf_stages + n_htmp_stages + 2)
    save_for_loss_pafs = [
        jax.random.normal(keys[i], paf_shape, dtype=jnp.float32)
        for i in range(n_paf_stages)
    ]
    save_for_loss_htmps = [
        jax.random.normal(keys[n_paf_stages + i], htmp_shape, dtype=jnp.float32)
        for i in range(n_htmp_stages)
    ]
    paf_target = jax.random.normal(keys[-2], paf_shape, dtype=jnp.float32)
    htmp_target = jax.random.normal(keys[-1], htmp_shape, dtype=jnp.float32)

    loss = pose_loss(save_for_loss_pafs, save_for_loss_htmps, paf_target, htmp_target)
    loss = jax.block_until_ready(loss)

    # Pure-JAX reference (matches nn.MSELoss default reduction='mean').
    ref = jnp.float32(0.0)
    for x in save_for_loss_pafs:
        ref += jnp.mean((x - paf_target) ** 2)
    for x in save_for_loss_htmps:
        ref += jnp.mean((x - htmp_target) ** 2)

    assert jnp.allclose(loss, ref, rtol=1e-5, atol=1e-5), (loss, ref)
    print("KERNEL_OK")
</pallas_src>

<mosaic_0001>
module attributes {stable_mosaic.version = 11 : i64} {
  func.func @kernel(%arg0: i32, %arg1: memref<2x8x128xf32, #tpu.memory_space<vmem>>, %arg2: memref<2x8x128xf32, #tpu.memory_space<vmem>>, %arg3: memref<2x8x128xf32, #tpu.memory_space<vmem>>, %arg4: memref<2x8x128xf32, #tpu.memory_space<vmem>>, %arg5: memref<1x8x128xf32, #tpu.memory_space<vmem>>) attributes {dimension_semantics = [#tpu.dimension_semantics<parallel>], iteration_bounds = array<i64: 1>, scalar_prefetch = 0 : i64, scratch_operands = 0 : i64, tpu.core_type = #tpu.core_type<tc>, window_params = [{transform_indices = @transform_0, window_bounds = array<i64: 2, 8, 128>}, {transform_indices = @transform_1, window_bounds = array<i64: 2, 8, 128>}, {transform_indices = @transform_2, window_bounds = array<i64: 2, 8, 128>}, {transform_indices = @transform_3, window_bounds = array<i64: 2, 8, 128>}, {transform_indices = @transform_4, window_bounds = array<i64: 1, 8, 128>}]} {
    %c0 = arith.constant 0 : index
    %c0_0 = arith.constant 0 : index
    %c0_1 = arith.constant 0 : index
    %0 = vector.load %arg4[%c0, %c0_0, %c0_1] : memref<2x8x128xf32, #tpu.memory_space<vmem>>, vector<2x8x128xf32>
    %cst = arith.constant 0.000000e+00 : f32
    %1 = vector.broadcast %cst : f32 to vector<1x8x128xf32>
    %c0_2 = arith.constant 0 : index
    %c0_3 = arith.constant 0 : index
    %c0_4 = arith.constant 0 : index
    %2 = vector.load %arg1[%c0_2, %c0_3, %c0_4] : memref<2x8x128xf32, #tpu.memory_space<vmem>>, vector<2x8x128xf32>
    %3 = arith.subf %2, %0 : vector<2x8x128xf32>
    %4 = arith.mulf %3, %3 : vector<2x8x128xf32>
    %cst_5 = arith.constant dense<0.000000e+00> : vector<8x128xf32>
    %5 = vector.multi_reduction <add>, %4, %cst_5 [0] : vector<2x8x128xf32> to vector<8x128xf32>
    %6 = vector.shape_cast %5 : vector<8x128xf32> to vector<1x8x128xf32>
    %7 = arith.addf %1, %6 : vector<1x8x128xf32>
    %c0_6 = arith.constant 0 : index
    %c0_7 = arith.constant 0 : index
    %c0_8 = arith.constant 0 : index
    %8 = vector.load %arg2[%c0_6, %c0_7, %c0_8] : memref<2x8x128xf32, #tpu.memory_space<vmem>>, vector<2x8x128xf32>
    %9 = arith.subf %8, %0 : vector<2x8x128xf32>
    %10 = arith.mulf %9, %9 : vector<2x8x128xf32>
    %cst_9 = arith.constant dense<0.000000e+00> : vector<8x128xf32>
    %11 = vector.multi_reduction <add>, %10, %cst_9 [0] : vector<2x8x128xf32> to vector<8x128xf32>
    %12 = vector.shape_cast %11 : vector<8x128xf32> to vector<1x8x128xf32>
    %13 = arith.addf %7, %12 : vector<1x8x128xf32>
    %c0_10 = arith.constant 0 : index
    %c0_11 = arith.constant 0 : index
    %c0_12 = arith.constant 0 : index
    %14 = vector.load %arg3[%c0_10, %c0_11, %c0_12] : memref<2x8x128xf32, #tpu.memory_space<vmem>>, vector<2x8x128xf32>
    %15 = arith.subf %14, %0 : vector<2x8x128xf32>
    %16 = arith.mulf %15, %15 : vector<2x8x128xf32>
    %cst_13 = arith.constant dense<0.000000e+00> : vector<8x128xf32>
    %17 = vector.multi_reduction <add>, %16, %cst_13 [0] : vector<2x8x128xf32> to vector<8x128xf32>
    %18 = vector.shape_cast %17 : vector<8x128xf32> to vector<1x8x128xf32>
    %19 = arith.addf %13, %18 : vector<1x8x128xf32>
    %c0_14 = arith.constant 0 : index
    %c0_15 = arith.constant 0 : index
    %c0_16 = arith.constant 0 : index
    %20 = vector.load %arg5[%c0_14, %c0_15, %c0_16] : memref<1x8x128xf32, #tpu.memory_space<vmem>>, vector<1x8x128xf32>
    tpu.vector_store %arg5[%c0_14, %c0_15, %c0_16], %19 {strides = array<i32>} : memref<1x8x128xf32, #tpu.memory_space<vmem>>, vector<1x8x128xf32>,
    return
  }
  func.func @transform_0(%arg0: i32) -> (i32, i32, i32) {
    %c0_i32 = arith.constant 0 : i32
    %c0_i32_0 = arith.constant 0 : i32
    %c0_i32_1 = arith.constant 0 : i32
    return %arg0, %c0_i32, %c0_i32_0 : i32, i32, i32
  }
  func.func @transform_1(%arg0: i32) -> (i32, i32, i32) {
    %c0_i32 = arith.constant 0 : i32
    %c0_i32_0 = arith.constant 0 : i32
    %c0_i32_1 = arith.constant 0 : i32
    return %arg0, %c0_i32, %c0_i32_0 : i32, i32, i32
  }
  func.func @transform_2(%arg0: i32) -> (i32, i32, i32) {
    %c0_i32 = arith.constant 0 : i32
    %c0_i32_0 = arith.constant 0 : i32
    %c0_i32_1 = arith.constant 0 : i32
    return %arg0, %c0_i32, %c0_i32_0 : i32, i32, i32
  }
  func.func @transform_3(%arg0: i32) -> (i32, i32, i32) {
    %c0_i32 = arith.constant 0 : i32
    %c0_i32_0 = arith.constant 0 : i32
    %c0_i32_1 = arith.constant 0 : i32
    return %arg0, %c0_i32, %c0_i32_0 : i32, i32, i32
  }
  func.func @transform_4(%arg0: i32) -> (i32, i32, i32) {
    %c0_i32 = arith.constant 0 : i32
    %c0_i32_0 = arith.constant 0 : i32
    %c0_i32_1 = arith.constant 0 : i32
    return %arg0, %c0_i32, %c0_i32_0 : i32, i32, i32
  }
}

module attributes {stable_mosaic.version = 11 : i64} {
  func.func @kernel(%arg0: i32, %arg1: memref<1x8x128xf32, #tpu.memory_space<vmem>>, %arg2: memref<1x8x128xf32, #tpu.memory_space<vmem>>, %arg3: memref<1x8x128xf32, #tpu.memory_space<vmem>>, %arg4: memref<1x8x128xf32, #tpu.memory_space<vmem>>, %arg5: memref<1x8x128xf32, #tpu.memory_space<vmem>>) attributes {dimension_semantics = [#tpu.dimension_semantics<parallel>], iteration_bounds = array<i64: 1>, scalar_prefetch = 0 : i64, scratch_operands = 0 : i64, tpu.core_type = #tpu.core_type<tc>, window_params = [{transform_indices = @transform_0, window_bounds = array<i64: 1, 8, 128>}, {transform_indices = @transform_1, window_bounds = array<i64: 1, 8, 128>}, {transform_indices = @transform_2, window_bounds = array<i64: 1, 8, 128>}, {transform_indices = @transform_3, window_bounds = array<i64: 1, 8, 128>}, {transform_indices = @transform_4, window_bounds = array<i64: 1, 8, 128>}]} {
    %c0 = arith.constant 0 : index
    %c0_0 = arith.constant 0 : index
    %c0_1 = arith.constant 0 : index
    %0 = vector.load %arg4[%c0, %c0_0, %c0_1] : memref<1x8x128xf32, #tpu.memory_space<vmem>>, vector<1x8x128xf32>
    %cst = arith.constant 0.000000e+00 : f32
    %1 = vector.broadcast %cst : f32 to vector<1x8x128xf32>
    %c0_2 = arith.constant 0 : index
    %c0_3 = arith.constant 0 : index
    %c0_4 = arith.constant 0 : index
    %2 = vector.load %arg1[%c0_2, %c0_3, %c0_4] : memref<1x8x128xf32, #tpu.memory_space<vmem>>, vector<1x8x128xf32>
    %3 = arith.subf %2, %0 : vector<1x8x128xf32>
    %4 = arith.mulf %3, %3 : vector<1x8x128xf32>
    %cst_5 = arith.constant dense<0.000000e+00> : vector<8x128xf32>
    %5 = vector.multi_reduction <add>, %4, %cst_5 [0] : vector<1x8x128xf32> to vector<8x128xf32>
    %6 = vector.shape_cast %5 : vector<8x128xf32> to vector<1x8x128xf32>
    %7 = arith.addf %1, %6 : vector<1x8x128xf32>
    %c0_6 = arith.constant 0 : index
    %c0_7 = arith.constant 0 : index
    %c0_8 = arith.constant 0 : index
    %8 = vector.load %arg2[%c0_6, %c0_7, %c0_8] : memref<1x8x128xf32, #tpu.memory_space<vmem>>, vector<1x8x128xf32>
    %9 = arith.subf %8, %0 : vector<1x8x128xf32>
    %10 = arith.mulf %9, %9 : vector<1x8x128xf32>
    %cst_9 = arith.constant dense<0.000000e+00> : vector<8x128xf32>
    %11 = vector.multi_reduction <add>, %10, %cst_9 [0] : vector<1x8x128xf32> to vector<8x128xf32>
    %12 = vector.shape_cast %11 : vector<8x128xf32> to vector<1x8x128xf32>
    %13 = arith.addf %7, %12 : vector<1x8x128xf32>
    %c0_10 = arith.constant 0 : index
    %c0_11 = arith.constant 0 : index
    %c0_12 = arith.constant 0 : index
    %14 = vector.load %arg3[%c0_10, %c0_11, %c0_12] : memref<1x8x128xf32, #tpu.memory_space<vmem>>, vector<1x8x128xf32>
    %15 = arith.subf %14, %0 : vector<1x8x128xf32>
    %16 = arith.mulf %15, %15 : vector<1x8x128xf32>
    %cst_13 = arith.constant dense<0.000000e+00> : vector<8x128xf32>
    %17 = vector.multi_reduction <add>, %16, %cst_13 [0] : vector<1x8x128xf32> to vector<8x128xf32>
    %18 = vector.shape_cast %17 : vector<8x128xf32> to vector<1x8x128xf32>
    %19 = arith.addf %13, %18 : vector<1x8x128xf32>
    %c0_14 = arith.constant 0 : index
    %c0_15 = arith.constant 0 : index
    %c0_16 = arith.constant 0 : index
    %20 = vector.load %arg5[%c0_14, %c0_15, %c0_16] : memref<1x8x128xf32, #tpu.memory_space<vmem>>, vector<1x8x128xf32>
    tpu.vector_store %arg5[%c0_14, %c0_15, %c0_16], %19 {strides = array<i32>} : memref<1x8x128xf32, #tpu.memory_space<vmem>>, vector<1x8x128xf32>,
    return
  }
  func.func @transform_0(%arg0: i32) -> (i32, i32, i32) {
    %c0_i32 = arith.constant 0 : i32
    %c0_i32_0 = arith.constant 0 : i32
    %c0_i32_1 = arith.constant 0 : i32
    return %arg0, %c0_i32, %c0_i32_0 : i32, i32, i32
  }
  func.func @transform_1(%arg0: i32) -> (i32, i32, i32) {
    %c0_i32 = arith.constant 0 : i32
    %c0_i32_0 = arith.constant 0 : i32
    %c0_i32_1 = arith.constant 0 : i32
    return %arg0, %c0_i32, %c0_i32_0 : i32, i32, i32
  }
  func.func @transform_2(%arg0: i32) -> (i32, i32, i32) {
    %c0_i32 = arith.constant 0 : i32
    %c0_i32_0 = arith.constant 0 : i32
    %c0_i32_1 = arith.constant 0 : i32
    return %arg0, %c0_i32, %c0_i32_0 : i32, i32, i32
  }
  func.func @transform_3(%arg0: i32) -> (i32, i32, i32) {
    %c0_i32 = arith.constant 0 : i32
    %c0_i32_0 = arith.constant 0 : i32
    %c0_i32_1 = arith.constant 0 : i32
    return %arg0, %c0_i32, %c0_i32_0 : i32, i32, i32
  }
  func.func @transform_4(%arg0: i32) -> (i32, i32, i32) {
    %c0_i32 = arith.constant 0 : i32
    %c0_i32_0 = arith.constant 0 : i32
    %c0_i32_1 = arith.constant 0 : i32
    return %arg0, %c0_i32, %c0_i32_0 : i32, i32, i32
  }
}

</mosaic_0001>

<bundles_post_ra>
// kernel: pose_loss.2
= control target key start
LH: loop header
LB: loop body
LE: loop exit
PB: predicated region body
PF: predicated region fallthrough
CT: control target
= control target key end

     0   :  { %s100_s0 = inlined_call_operand.vmem [shape: f32[2,8,128], index: 0, kind: input, shape index: {}]   ;;  %s101_s1 = inlined_call_operand.vmem [shape: f32[2,8,128], index: 1, kind: input, shape index: {}]   ;;  %s102_s2 = inlined_call_operand.vmem [shape: f32[2,8,128], index: 2, kind: input, shape index: {}]   ;;  %s103_s3 = inlined_call_operand.vmem [shape: f32[2,8,128], index: 3, kind: input, shape index: {}]   ;;  %s104_s4 = inlined_call_operand.vmem [shape: f32[1,8,128], index: 4, kind: output, shape index: {}]  }
   0x1   :  { %v17_v0 = vld [vmem:[%s103_s3] sm:$0xff]  ;;  %v18_v1 = vld [vmem:[%s103_s3 + $0x8] sm:$0xff] }
   0x2   :  { %v19_v2 = vld [vmem:[%s100_s0] sm:$0xff]  ;;  %v20_v3 = vld [vmem:[%s100_s0 + $0x8] sm:$0xff] }
   0x3   :  { %v21_v4 = vsub.f32 %v19_v2, %v17_v0  ;;  %v27_v5 = vld [vmem:[%s101_s1] sm:$0xff]  ;;  %v28_v6 = vld [vmem:[%s101_s1 + $0x8] sm:$0xff]  ;;  %v22_v7 = vsub.f32 %v20_v3, %v18_v1 }
   0x4   :  { %v29_v8 = vsub.f32 %v27_v5, %v17_v0  ;;  %v30_v9 = vsub.f32 %v28_v6, %v18_v1  ;;  %v35_v10 = vld [vmem:[%s102_s2] sm:$0xff]  ;;  %v36_v11 = vld [vmem:[%s102_s2 + $0x8] sm:$0xff] }
   0x5   :  { %v23_v12 = vmul.f32 %v21_v4, %v21_v4  ;;  %v37_v13 = vsub.f32 %v35_v10, %v17_v0  ;;  %v38_v14 = vsub.f32 %v36_v11, %v18_v1  ;;  %v24_v15 = vmul.f32 %v22_v7, %v22_v7 }
   0x6   :  { %v31_v16 = vmul.f32 %v29_v8, %v29_v8  ;;  %v32_v17 = vmul.f32 %v30_v9, %v30_v9 }
   0x7   :  { %v39_v18 = vmul.f32 %v37_v13, %v37_v13  ;;  %v40_v19 = vmul.f32 %v38_v14, %v38_v14  ;;  %v25_v20 = vadd.f32 %v24_v15, %v23_v12 }
   0x8   :  { %v33_v21 = vadd.f32 %v32_v17, %v31_v16 }
   0x9   :  { %v41_v22 = vadd.f32 %v40_v19, %v39_v18 }
   0xa   :  { %v34_v23 = vadd.f32 %v33_v21, %v25_v20 }
   0xc   :  { %v42_v24 = vadd.f32 %v41_v22, %v34_v23 }
   0xe   :  { %43 = vst [vmem:[%s104_s4] sm:$0xff] %v42_v24 }

// kernel: pose_loss.3
= control target key start
LH: loop header
LB: loop body
LE: loop exit
PB: predicated region body
PF: predicated region fallthrough
CT: control target
= control target key end

     0   :  { %s78_s0 = inlined_call_operand.vmem [shape: f32[1,8,128], index: 0, kind: input, shape index: {}]   ;;  %s79_s1 = inlined_call_operand.vmem [shape: f32[1,8,128], index: 1, kind: input, shape index: {}]   ;;  %s80_s2 = inlined_call_operand.vmem [shape: f32[1,8,128], index: 2, kind: input, shape index: {}]   ;;  %s81_s3 = inlined_call_operand.vmem [shape: f32[1,8,128], index: 3, kind: input, shape index: {}]   ;;  %s82_s4 = inlined_call_operand.vmem [shape: f32[1,8,128], index: 4, kind: output, shape index: {}]  }
   0x1   :  { %v17_v0 = vld [vmem:[%s81_s3] sm:$0xff] }
   0x2   :  { %v18_v1 = vld [vmem:[%s78_s0] sm:$0xff] }
   0x3   :  { %v23_v2 = vld [vmem:[%s79_s1] sm:$0xff]  ;;  %v19_v3 = vsub.f32 %v18_v1, %v17_v0 }
   0x4   :  { %v24_v4 = vsub.f32 %v23_v2, %v17_v0  ;;  %v28_v5 = vld [vmem:[%s80_s2] sm:$0xff] }
   0x5   :  { %v29_v6 = vsub.f32 %v28_v5, %v17_v0  ;;  %v20_v7 = vmul.f32 %v19_v3, %v19_v3 }
   0x6   :  { %v25_v8 = vmul.f32 %v24_v4, %v24_v4 }
   0x7   :  { %v30_v9 = vmul.f32 %v29_v6, %v29_v6 }
   0x8   :  { %v27_v10 = vadd.f32 %v25_v8, %v20_v7 }
   0xa   :  { %v32_v11 = vadd.f32 %v30_v9, %v27_v10 }
   0xc   :  { %33 = vst [vmem:[%s82_s4] sm:$0xff] %v32_v11 }

</bundles_post_ra>
